<compile_context>
chip_gen: v7x
topology: tpu7x:2x2x1
jax: 0.10.0
libtpu: 0.0.40
codegen_flags: <defaults>
</compile_context>

<pallas_src>
import functools
import math

import jax
import jax.numpy as jnp
from jax.experimental import pallas as pl
from jax.experimental.pallas import tpu as pltpu


_VMEM_LIMIT_BYTES = 48 * 1024 * 1024   # fits v5e/v6e (128 MiB) and v7x (64 MiB)


# ---------------------------------------------------------------------------
# Kernel 1: tiled linear  y = x @ W + b
# ---------------------------------------------------------------------------
def _linear_kernel(x_ref, w_ref, b_ref, o_ref, acc_ref):
    @pl.when(pl.program_id(2) == 0)
    def _init():
        acc_ref[...] = jnp.zeros_like(acc_ref)

    # bf16 x bf16 -> f32 accumulate on the MXU.
    acc_ref[...] += jnp.dot(x_ref[...], w_ref[...],
                            preferred_element_type=jnp.float32)

    @pl.when(pl.program_id(2) == pl.num_programs(2) - 1)
    def _finalize():
        o_ref[...] = (acc_ref[...] + b_ref[...]).astype(o_ref.dtype)


def _sublane_tile(n, cap=128):
    if n <= cap:
        return n
    for t in range(cap, 7, -8):
        if n % t == 0:
            return t
    return n


def _lane_tile(n, cap=512):
    t = cap
    while t >= 128:
        if n % t == 0:
            return t
        t -= 128
    return n


def _linear(x, w, b, *, out_dtype):
    M, K = x.shape
    Kw, N = w.shape
    assert K == Kw and b.shape == (1, N)
    tm = _sublane_tile(M)
    tn = _lane_tile(N)
    tk = _lane_tile(K)
    grid = (M // tm, N // tn, K // tk)
    return pl.pallas_call(
        _linear_kernel,
        out_shape=jax.ShapeDtypeStruct((M, N), out_dtype),
        grid_spec=pltpu.PrefetchScalarGridSpec(
            num_scalar_prefetch=0,
            grid=grid,
            in_specs=[
                pl.BlockSpec((tm, tk), lambda i, j, k: (i, k)),
                pl.BlockSpec((tk, tn), lambda i, j, k: (k, j)),
                pl.BlockSpec((1, tn), lambda i, j, k: (0, j)),
            ],
            out_specs=pl.BlockSpec((tm, tn), lambda i, j, k: (i, j)),
            scratch_shapes=[pltpu.VMEM((tm, tn), jnp.float32)],
        ),
        compiler_params=pltpu.CompilerParams(
            dimension_semantics=("parallel", "parallel", "arbitrary"),
            vmem_limit_bytes=_VMEM_LIMIT_BYTES),
    )(x, w, b)


# ---------------------------------------------------------------------------
# Kernel 2: flash attention (heads folded into the leading batch dim)
# ---------------------------------------------------------------------------
def _flash_kernel(q_ref, k_ref, v_ref, o_ref, m_ref, l_ref, acc_ref, *, sm_scale):
    kv_idx = pl.program_id(2)

    @pl.when(kv_idx == 0)
    def _init():
        m_ref[...] = jnp.full_like(m_ref, -jnp.inf)
        l_ref[...] = jnp.zeros_like(l_ref)
        acc_ref[...] = jnp.zeros_like(acc_ref)

    q = q_ref[...]            # (BB, TQ, dk) bf16
    k = k_ref[...]            # (BB, TK, dk) bf16
    v = v_ref[...]            # (BB, TK, dk) bf16

    # Scores: contract dk directly -- no materialized K transpose.
    s = jax.lax.dot_general(q, k, (((2,), (2,)), ((0,), (0,))),
                            preferred_element_type=jnp.float32) * sm_scale
    # TODO(synk): optional attention mask (masked_fill(mask==0, -1e9)) not
    # plumbed through; this implements the mask=None path only.

    m_prev = m_ref[...]
    m_new = jnp.maximum(m_prev, jnp.max(s, axis=-1, keepdims=True))
    alpha = jnp.exp(m_prev - m_new)                       # f32
    p = jnp.exp(s - m_new)                                # f32
    l_ref[...] = alpha * l_ref[...] + jnp.sum(p, axis=-1, keepdims=True)
    acc_ref[...] = alpha * acc_ref[...] + jax.lax.dot_general(
        p.astype(v.dtype), v, (((2,), (1,)), ((0,), (0,))),
        preferred_element_type=jnp.float32)
    m_ref[...] = m_new

    @pl.when(kv_idx == pl.num_programs(2) - 1)
    def _finalize():
        inv_l = pl.reciprocal(l_ref[...], approx=True)    # EUP slot, ~free
        o_ref[...] = (acc_ref[...] * inv_l).astype(o_ref.dtype)


def _flash_attention(q, k, v, *, sm_scale, q_tile=128, kv_tile=128):
    BH, S, dk = q.shape
    TQ = min(q_tile, S)
    TK = min(kv_tile, S)
    assert S % TQ == 0 and S % TK == 0, "seq len must divide the q/kv tiles"

    # Fold several (batch*head) rows per grid step when TQ is small so the MXU
    # M dimension stays near 128 even for short sequences.
    target = max(1, 128 // TQ)
    BB = 1
    for c in range(1, min(BH, target) + 1):
        if BH % c == 0:
            BB = c

    grid = (BH // BB, S // TQ, S // TK)
    kernel = functools.partial(_flash_kernel, sm_scale=sm_scale)
    return pl.pallas_call(
        kernel,
        out_shape=jax.ShapeDtypeStruct((BH, S, dk), jnp.bfloat16),
        grid_spec=pltpu.PrefetchScalarGridSpec(
            num_scalar_prefetch=0,
            grid=grid,
            in_specs=[
                pl.BlockSpec((BB, TQ, dk), lambda b, i, j: (b, i, 0)),
                pl.BlockSpec((BB, TK, dk), lambda b, i, j: (b, j, 0)),
                pl.BlockSpec((BB, TK, dk), lambda b, i, j: (b, j, 0)),
            ],
            out_specs=pl.BlockSpec((BB, TQ, dk), lambda b, i, j: (b, i, 0)),
            scratch_shapes=[
                pltpu.VMEM((BB, TQ, 1), jnp.float32),     # running max
                pltpu.VMEM((BB, TQ, 1), jnp.float32),     # running sum
                pltpu.VMEM((BB, TQ, dk), jnp.float32),    # output accumulator
            ],
        ),
        compiler_params=pltpu.CompilerParams(
            dimension_semantics=("parallel", "parallel", "arbitrary"),
            vmem_limit_bytes=_VMEM_LIMIT_BYTES),
    )(q, k, v)


# ---------------------------------------------------------------------------
# Full module forward
# ---------------------------------------------------------------------------
def multi_head_attention(query, key, value, params, *, n_heads,
                         q_tile=128, kv_tile=128):
    """query/key/value: (B, S, H) float32.  params: dict of pre-transposed weights."""
    B, S, H = query.shape
    assert H % n_heads == 0
    dk = H // n_heads
    bf16 = jnp.bfloat16

    # bf16 MXU operands (f32 accumulation happens in-kernel); biases stay f32.
    wq, wk, wv, wo = (params[n].astype(bf16) for n in ("wq", "wk", "wv", "wo"))
    bq, bk, bv, bo = (params[n] for n in ("bq", "bk", "bv", "bo"))

    x_q = query.reshape(B * S, H).astype(bf16)
    x_k = key.reshape(B * S, H).astype(bf16)
    x_v = value.reshape(B * S, H).astype(bf16)

    # Q/K/V projections: M = B*S rows per GEMM (keeps the MXU fed).
    q_p = _linear(x_q, wq, bq, out_dtype=bf16)
    k_p = _linear(x_k, wk, bk, out_dtype=bf16)
    v_p = _linear(x_v, wv, bv, out_dtype=bf16)

    # Head split: wrapper-side layout plumbing (XLA). Heads become a leading
    # batch dim so the attention kernel never slices sub-128 lane ranges.
    def to_heads(x):
        return jnp.transpose(x.reshape(B, S, n_heads, dk),
                             (0, 2, 1, 3)).reshape(B * n_heads, S, dk)

    ctx = _flash_attention(to_heads(q_p), to_heads(k_p), to_heads(v_p),
                           sm_scale=1.0 / math.sqrt(dk),
                           q_tile=q_tile, kv_tile=kv_tile)

    # Head merge (== transpose(1, 2).contiguous().view(B, S, H) in PyTorch).
    cv = jnp.transpose(ctx.reshape(B, n_heads, S, dk),
                       (0, 2, 1, 3)).reshape(B * S, H).astype(bf16)

    out = _linear(cv, wo, bo, out_dtype=jnp.float32)
    # Dropout: identity at inference.
    return out.reshape(B, S, H)


def init_params(key, hidden_size):
    """Deterministic init matching torch.nn.Linear's U(-1/sqrt(H), 1/sqrt(H)).
    Weights are stored already transposed to (H_in, H_out), in float32."""
    bound = 1.0 / math.sqrt(hidden_size)
    keys = jax.random.split(key, 8)

    def w(k):
        return jax.random.uniform(k, (hidden_size, hidden_size),
                                  jnp.float32, -bound, bound)

    def b(k):
        return jax.random.uniform(k, (1, hidden_size), jnp.float32, -bound, bound)

    return {
        "wq": w(keys[0]), "bq": b(keys[1]),
        "wk": w(keys[2]), "bk": b(keys[3]),
        "wv": w(keys[4]), "bv": b(keys[5]),
        "wo": w(keys[6]), "bo": b(keys[7]),
    }


def reference(query, key, value, params, *, n_heads):
    """Pure-JAX f32 reference mirroring the PyTorch forward (mask=None, no dropout)."""
    B, S, H = query.shape
    dk = H // n_heads

    def lin(x, w, b):
        return x @ w + b

    q = jnp.transpose(lin(query, params["wq"], params["bq"])
                      .reshape(B, S, n_heads, dk), (0, 2, 1, 3))
    k = jnp.transpose(lin(key, params["wk"], params["bk"])
                      .reshape(B, S, n_heads, dk), (0, 2, 1, 3))
    v = jnp.transpose(lin(value, params["wv"], params["bv"])
                      .reshape(B, S, n_heads, dk), (0, 2, 1, 3))
    scores = (q @ jnp.swapaxes(k, -2, -1)) / math.sqrt(dk)
    attn = jax.nn.softmax(scores, axis=-1)
    cv = jnp.transpose(attn @ v, (0, 2, 1, 3)).reshape(B, S, H)
    return lin(cv, params["wo"], params["bo"])


if __name__ == "__main__":
    B, S, H = 2, 16, 32
    n_heads = 4

    root = jax.random.PRNGKey(0)
    kq, kk, kv, kp = jax.random.split(root, 4)
    query = jax.random.normal(kq, (B, S, H), jnp.float32)
    key_in = jax.random.normal(kk, (B, S, H), jnp.float32)
    value = jax.random.normal(kv, (B, S, H), jnp.float32)
    params = init_params(kp, H)

    # Small q/kv tiles so even the toy shapes exercise the multi-step online
    # softmax (kv) loop and the query-tile grid axis.
    out = multi_head_attention(query, key_in, value, params,
                               n_heads=n_heads, q_tile=8, kv_tile=8)
    out = jax.block_until_ready(out)

    ref = reference(query, key_in, value, params, n_heads=n_heads)
    assert out.shape == (B, S, H)
    # bf16 matmul operands (f32 accumulation) + approx softmax reciprocal:
    # agreement with the pure-f32 reference is at the ~1e-2 level, not 1e-4.
    max_err = float(jnp.max(jnp.abs(out - ref)))
    assert jnp.allclose(out, ref, atol=3e-2, rtol=3e-2), (
        f"mismatch vs reference: max abs err {max_err}")

    print("KERNEL_OK")
</pallas_src>

<mosaic_0001>
module attributes {stable_mosaic.version = 11 : i64} {
  func.func @_linear_kernel(%arg0: i32, %arg1: i32, %arg2: i32, %arg3: memref<32x32xbf16, #tpu.memory_space<vmem>>, %arg4: memref<32x32xbf16, #tpu.memory_space<vmem>>, %arg5: memref<1x32xf32, #tpu.memory_space<vmem>>, %arg6: memref<32x32xbf16, #tpu.memory_space<vmem>>, %arg7: memref<32x32xf32, #tpu.memory_space<vmem>>) attributes {dimension_semantics = [#tpu.dimension_semantics<parallel>, #tpu.dimension_semantics<parallel>, #tpu.dimension_semantics<arbitrary>], iteration_bounds = array<i64: 1, 1, 1>, scalar_prefetch = 0 : i64, scratch_operands = 1 : i64, tpu.core_type = #tpu.core_type<tc>, window_params = [{transform_indices = @transform_0, window_bounds = array<i64: 32, 32>}, {transform_indices = @transform_1, window_bounds = array<i64: 32, 32>}, {transform_indices = @transform_2, window_bounds = array<i64: 1, 32>}, {transform_indices = @transform_3, window_bounds = array<i64: 32, 32>}]} {
    %c0_i32 = arith.constant 0 : i32
    %0 = arith.cmpi eq, %arg2, %c0_i32 : i32
    %1 = arith.extui %0 : i1 to i32
    %c0_i32_0 = arith.constant 0 : i32
    %2 = arith.cmpi ne, %1, %c0_i32_0 : i32
    scf.if %2 {
      %cst_10 = arith.constant 0.000000e+00 : f32
      %12 = vector.broadcast %cst_10 : f32 to vector<32x32xf32>
      %c0_11 = arith.constant 0 : index
      %c0_12 = arith.constant 0 : index
      %13 = vector.load %arg7[%c0_11, %c0_12] : memref<32x32xf32, #tpu.memory_space<vmem>>, vector<32x32xf32>
      tpu.vector_store %arg7[%c0_11, %c0_12], %12 {strides = array<i32>} : memref<32x32xf32, #tpu.memory_space<vmem>>, vector<32x32xf32>,
    } else {
    }
    %c0 = arith.constant 0 : index
    %c0_1 = arith.constant 0 : index
    %3 = vector.load %arg7[%c0, %c0_1] : memref<32x32xf32, #tpu.memory_space<vmem>>, vector<32x32xf32>
    %c0_2 = arith.constant 0 : index
    %c0_3 = arith.constant 0 : index
    %4 = vector.load %arg3[%c0_2, %c0_3] : memref<32x32xbf16, #tpu.memory_space<vmem>>, vector<32x32xbf16>
    %c0_4 = arith.constant 0 : index
    %c0_5 = arith.constant 0 : index
    %5 = vector.load %arg4[%c0_4, %c0_5] : memref<32x32xbf16, #tpu.memory_space<vmem>>, vector<32x32xbf16>
    %cst = arith.constant dense<0.000000e+00> : vector<32x32xf32>
    %6 = tpu.matmul %4, %5, %cst {dimension_numbers = #tpu.dot_dimension_numbers<[1], [0], [0], [1], [0, 0, 1, 1], [], []>} : vector<32x32xbf16>, vector<32x32xbf16>, vector<32x32xf32> -> vector<32x32xf32>
    %7 = arith.addf %3, %6 : vector<32x32xf32>
    %c0_6 = arith.constant 0 : index
    %c0_7 = arith.constant 0 : index
    %8 = vector.load %arg7[%c0_6, %c0_7] : memref<32x32xf32, #tpu.memory_space<vmem>>, vector<32x32xf32>
    tpu.vector_store %arg7[%c0_6, %c0_7], %7 {strides = array<i32>} : memref<32x32xf32, #tpu.memory_space<vmem>>, vector<32x32xf32>,
    %c0_i32_8 = arith.constant 0 : i32
    %9 = arith.cmpi eq, %arg2, %c0_i32_8 : i32
    %10 = arith.extui %9 : i1 to i32
    %c0_i32_9 = arith.constant 0 : i32
    %11 = arith.cmpi ne, %10, %c0_i32_9 : i32
    scf.if %11 {
      %c0_10 = arith.constant 0 : index
      %c0_11 = arith.constant 0 : index
      %12 = vector.load %arg7[%c0_10, %c0_11] : memref<32x32xf32, #tpu.memory_space<vmem>>, vector<32x32xf32>
      %c0_12 = arith.constant 0 : index
      %c0_13 = arith.constant 0 : index
      %13 = vector.load %arg5[%c0_12, %c0_13] : memref<1x32xf32, #tpu.memory_space<vmem>>, vector<1x32xf32>
      %14 = vector.broadcast %13 : vector<1x32xf32> to vector<32x32xf32>
      %15 = arith.addf %12, %14 : vector<32x32xf32>
      %16 = arith.truncf %15 : vector<32x32xf32> to vector<32x32xbf16>
      %c0_14 = arith.constant 0 : index
      %c0_15 = arith.constant 0 : index
      %17 = vector.load %arg6[%c0_14, %c0_15] : memref<32x32xbf16, #tpu.memory_space<vmem>>, vector<32x32xbf16>
      tpu.vector_store %arg6[%c0_14, %c0_15], %16 {strides = array<i32>} : memref<32x32xbf16, #tpu.memory_space<vmem>>, vector<32x32xbf16>,
    } else {
    }
    return
  }
  func.func @transform_0(%arg0: i32, %arg1: i32, %arg2: i32) -> (i32, i32) {
    %c0_i32 = arith.constant 0 : i32
    return %arg0, %arg2 : i32, i32
  }
  func.func @transform_1(%arg0: i32, %arg1: i32, %arg2: i32) -> (i32, i32) {
    %c0_i32 = arith.constant 0 : i32
    return %arg2, %arg1 : i32, i32
  }
  func.func @transform_2(%arg0: i32, %arg1: i32, %arg2: i32) -> (i32, i32) {
    %c0_i32 = arith.constant 0 : i32
    %c0_i32_0 = arith.constant 0 : i32
    return %c0_i32, %arg1 : i32, i32
  }
  func.func @transform_3(%arg0: i32, %arg1: i32, %arg2: i32) -> (i32, i32) {
    %c0_i32 = arith.constant 0 : i32
    return %arg0, %arg1 : i32, i32
  }
}

</mosaic_0001>

<bundles_post_ra>
// kernel: tpu_custom_call.1
= control target key start
LH: loop header
LB: loop body
LE: loop exit
PB: predicated region body
PF: predicated region fallthrough
CT: control target
= control target key end

     0   :  { %8 = vsyncpa [#allocation4], 0  ;;  %s401_s0 = inlined_call_operand.hbm [shape: bf16[32,32], index: 0, kind: input, shape index: {}]   ;;  %s402_s1 = inlined_call_operand.hbm [shape: bf16[32,32], index: 1, kind: input, shape index: {}]   ;;  %s403_s2 = inlined_call_operand.vmem [shape: f32[1,32], index: 2, kind: input, shape index: {}]   ;;  %s404_s3 = inlined_call_operand.hbm [shape: bf16[32,32], index: 3, kind: output, shape index: {}]  }
   0x1   :  { %9 = vsyncpa [#allocation7], 0 }
   0x2   :  { %10 = vsyncpa [#allocation5], 0  ;;  %s317_s12 = smov [#allocation3]   ;;  %s245_s16 = scalar_lea.hbm %s401_s0, 256 }
   0x3   :  { %s16_s13 = sshll.u32 %s317_s12, 4  ;;  %p246_p0 = scmp.ne.s32.totalorder %s401_s0, %s245_s16  ;;  %s17_s13 = int_to_ptr.vmem [resolvable:$true] %s16_s13 }
   0x4   :  { %p249_p1 = scmp.lt.u32.totalorder %s245_s16, %s401_s0 }
   0x6   :  { %p251_p2 = pnand %p249_p1, %p246_p0 }
   0x8   :  { %254 = shalt.err (!%p251_p2)
}
   0x9   :  { %s255_s21 = scalar_lea.vmem %s17_s13, 256  ;;  %p260_p4 = scmp.lt.s32.totalorder %s17_s13, %s17_s13 }
   0xa   :  { %p256_p3 = scmp.ne.s32.totalorder %s17_s13, %s255_s21  ;;  %p261_p5 = scmp.lt.s32.totalorder %s255_s21, %s255_s21 }
   0xc   :  { %p262_p6 = por %p261_p5, %p260_p4 }
   0xe   :  { %p263_p7 = pnand %p262_p6, %p256_p3 }
  0x10   :  { %266 = shalt.err (!%p263_p7)
}
  0x11   :  { %s318_s22 = smov 64   ;;  %s319_s23 = smov 4  }
  0x12   :  { %22 = dma.hbm_to_vmem [thread:$0]  %s401_s0, 256, %s17_s13, [#allocation4], %s318_s22, %s318_s22, %s319_s23  }
  0x13   :  { %s320_s26 = smov [#allocation6]   ;;  %s267_s30 = scalar_lea.hbm %s402_s1, 256 }
  0x14   :  { %s28_s27 = sshll.u32 %s320_s26, 4  ;;  %p268_p8 = scmp.ne.s32.totalorder %s402_s1, %s267_s30  ;;  %s29_s27 = int_to_ptr.vmem [resolvable:$true] %s28_s27 }
  0x15   :  { %p271_p9 = scmp.lt.u32.totalorder %s267_s30, %s402_s1 }
  0x17   :  { %p273_p10 = pnand %p271_p9, %p268_p8 }
  0x19   :  { %276 = shalt.err (!%p273_p10)
}
  0x1a   :  { %s277_s8 = scalar_lea.vmem %s29_s27, 256  ;;  %p282_p12 = scmp.lt.s32.totalorder %s29_s27, %s29_s27 }
  0x1b   :  { %p278_p11 = scmp.ne.s32.totalorder %s29_s27, %s277_s8  ;;  %p283_p13 = scmp.lt.s32.totalorder %s277_s8, %s277_s8 }
  0x1d   :  { %p284_p0 = por %p283_p13, %p282_p12 }
  0x1f   :  { %p285_p1 = pnand %p284_p0, %p278_p11 }
  0x21   :  { %288 = shalt.err (!%p285_p1)
}
  0x22   :  { %34 = dma.hbm_to_vmem [thread:$0]  %s402_s1, 256, %s29_s27, [#allocation7], %s318_s22, %s318_s22, %s319_s23  }
  0x23   :  { %311 = dma.done.wait [#allocation4], 256  }
  0x24   :  { %312 = vsyncadd [#allocation4], 4294967040 }
  0x25   :  { %313 = dma.done.wait [#allocation7], 256  }
  0x26   :  { %314 = vsyncadd [#allocation7], 4294967040  ;;  %vm48_vm0 = vcmask 261120   ;;  %v321_v0 = vmov 0.0   ;;  %v241_v1 = vld [vmem:[#allocation6] sm:$0xff]   ;;  %v242_v2 = vld [vmem:[#allocation6 + $0x8] sm:$0xff]  }
  0x27   :  { %51 = vst.msk [vmem:[#allocation2 + $0x10] sm:$0xff] %vm48_vm0, %v321_v0  ;;  %49 = vst.msk [vmem:[#allocation2] sm:$0xff] %vm48_vm0, %v321_v0  ;;  %227 = vmatprep.subr.bf16.mxu0 %v241_v1  ;;  %v243_v3 = vld [vmem:[#allocation3] sm:$0xff]   ;;  %v244_v4 = vld [vmem:[#allocation3 + $0x8] sm:$0xff]   ;;  %vm185_vm1 = vcmask 257024   ;;  %s322_s11 = smov [#allocation8]  }
  0x28   :  { %50 = vst.msk [vmem:[#allocation2 + $0x8] sm:$0xff] %vm48_vm0, %v321_v0  ;;  %52 = vst.msk [vmem:[#allocation2 + $0x18] sm:$0xff] %vm48_vm0, %v321_v0  ;;  %228 = vmatpush3.bf16.msra.mxu0 %v241_v1  ;;  %231 = vmatprep.mubr.msk.bf16.mxu0 %vm48_vm0, %v243_v3  ;;  %v214_v17 = vld [vmem:[%s403_s2] ss:$0 sm:$0xff]  ;;  %s195_s12 = sshll.u32 %s322_s11, 4  ;;  %s196_s12 = int_to_ptr.vmem [resolvable:$true] %s195_s12 }
  0x29   :  { %229 = vmatprep.subr.bf16.mxu0 %v242_v2  ;;  %s289_s2 = scalar_lea.vmem %s196_s12, 256  ;;  %p294_p3 = scmp.lt.s32.totalorder %s196_s12, %s196_s12 }
  0x2a   :  { %p290_p2 = scmp.ne.s32.totalorder %s196_s12, %s289_s2  ;;  %p295_p4 = scmp.lt.s32.totalorder %s289_s2, %s289_s2 }
  0x2c   :  { %230 = vmatpush3.bf16.msra.mxu0 %v242_v2  ;;  %p296_p5 = por %p295_p4, %p294_p3 }
  0x2e   :  { %v55_v5 = vld [vmem:[#allocation2 + $0x10] sm:$0xff]  ;;  %v53_v6 = vld [vmem:[#allocation2] sm:$0xff]  ;;  %p297_p6 = pnand %p296_p5, %p290_p2 }
  0x2f   :  { %232 = vmatmul.mubr.msk.bf16.vlgmr.msra.gmra.mrb[0].mxu0 %vm48_vm0, %v244_v4  ;;  %v56_v8 = vld [vmem:[#allocation2 + $0x18] sm:$0xff]  ;;  %v54_v11 = vld [vmem:[#allocation2 + $0x8] sm:$0xff] }
 0x102   :  { %v233_v7 = vpop.f32.mrb[0].mxu0 }
 0x103   :  { %v145_v9 = vadd.f32 %v233_v7, %v55_v5  ;;  %v128_v10 = vpop.f32.mrb[1].mxu0 }
 0x104   :  { %v143_v12 = vadd.f32 %v128_v10, %v53_v6  ;;  %v234_v13 = vpop.f32.mrb[2].mxu0 }
 0x105   :  { %149 = vst.msk [vmem:[#allocation2 + $0x10] sm:$0xff] %vm48_vm0, %v145_v9  ;;  %v146_v14 = vadd.f32 %v234_v13, %v56_v8  ;;  %v131_v15 = vpop.f32.mrb[3].mxu0 }
 0x106   :  { %147 = vst.msk [vmem:[#allocation2] sm:$0xff] %vm48_vm0, %v143_v12  ;;  %v144_v16 = vadd.f32 %v131_v15, %v54_v11 }
 0x107   :  { %150 = vst.msk [vmem:[#allocation2 + $0x18] sm:$0xff] %vm48_vm0, %v146_v14 }
 0x108   :  { %148 = vst.msk [vmem:[#allocation2 + $0x8] sm:$0xff] %vm48_vm0, %v144_v16 }
 0x10c   :  { %v156_v18 = vld [vmem:[#allocation2 + $0x10] sm:$0xff] }
 0x10d   :  { %v154_v19 = vld [vmem:[#allocation2] sm:$0xff]  ;;  %v167_v20 = vadd.f32 %v214_v17, %v156_v18 }
 0x10e   :  { %v157_v21 = vld [vmem:[#allocation2 + $0x18] sm:$0xff]  ;;  %v165_v22 = vadd.f32 %v214_v17, %v154_v19 }
 0x10f   :  { %v155_v23 = vld [vmem:[#allocation2 + $0x8] sm:$0xff]  ;;  %v168_v24 = vadd.f32 %v214_v17, %v157_v21  ;;  %v221_v25 = vpack.c.bf16 %v167_v20, %v167_v20 }
 0x110   :  { %v166_v26 = vadd.f32 %v214_v17, %v155_v23  ;;  %v219_v27 = vpack.c.bf16 %v165_v22, %v165_v22 }
 0x111   :  { %v222_v28 = vpack.c.bf16 %v168_v24, %v168_v24  ;;  %188 = vst.msk [vmem:[#allocation8 + $0x8] sm:$0xf] %vm185_vm1, %v221_v25 }
 0x112   :  { %v220_v29 = vpack.c.bf16 %v166_v26, %v166_v26  ;;  %186 = vst.msk [vmem:[#allocation8] sm:$0xf] %vm185_vm1, %v219_v27 }
 0x113   :  { %189 = vst.msk [vmem:[#allocation8 + $0xc] sm:$0xf] %vm185_vm1, %v222_v28 }
 0x114   :  { %187 = vst.msk [vmem:[#allocation8 + $0x4] sm:$0xf] %vm185_vm1, %v220_v29 }
 0x115   :  { %300 = shalt.err (!%p297_p6)
}
 0x116   :  { %s301_s15 = scalar_lea.hbm %s404_s3, 256 }
 0x117   :  { %p302_p7 = scmp.ne.s32.totalorder %s404_s3, %s301_s15  ;;  %p305_p8 = scmp.lt.u32.totalorder %s301_s15, %s404_s3 }
 0x119   :  { %p307_p9 = pnand %p305_p8, %p302_p7 }
 0x11b   :  { %310 = shalt.err (!%p307_p9)
}
 0x11c   :  { %201 = dma.vmem_to_hbm [thread:$0]  %s196_s12, 256, %s404_s3, [#allocation5], %s318_s22, %s318_s22, %s319_s23  }
 0x11d   :  { %315 = dma.done.wait [#allocation5], 256  }
 0x11e   :  { %316 = vsyncadd [#allocation5], 4294967040 }
 0x11f   :  { %205 = vsyncpa [#allocation4], 1 }
 0x120   :  { %206 = vsyncpa [#allocation7], 1 }
 0x121   :  { %207 = vsyncpa [#allocation5], 1 }

</bundles_post_ra>
